<compile_context>
chip_gen: v7x
topology: tpu7x:2x2x1
jax: 0.10.0
libtpu: 0.0.40
codegen_flags: <defaults>
</compile_context>

<pallas_src>
import functools

import jax
import jax.numpy as jnp
from jax.experimental import pallas as pl
from jax.experimental.pallas import tpu as pltpu

BN_EPS = 1e-5


def _round_up(x, m):
    return ((x + m - 1) // m) * m


def _vmem_capacity_bytes():
    """Physical per-core VMEM bytes; conservative 64 MiB (v7x) fallback."""
    try:
        info = pltpu.get_tpu_info()
        cap = getattr(info, "vmem_capacity_bytes", None)
        if cap:
            return int(cap)
    except Exception:
        pass
    return 64 * 1024 * 1024


def _const_spec(shape):
    """BlockSpec for a grid-invariant (VMEM-resident) operand; single-buffered if supported."""
    index_map = lambda i: (0, 0)
    try:
        return pl.BlockSpec(shape, index_map, pipeline_mode=pl.Buffered(1))
    except (TypeError, ValueError):
        return pl.BlockSpec(shape, index_map)


def _make_encoder_kernel(num_layers):
    """Fused [Linear, ReLU, BN(eval), Dropout(eval)] x num_layers.

    Ref order: x (f32), then per layer (w bf16 [in,out], vec f32), then out.
    vec is (1, hd) = bias for inner layers (their BN is folded into the next W),
    and (3, hd) = [bias; scale; shift] for the final layer.
    """

    def kernel(*refs):
        x_ref = refs[0]
        o_ref = refs[-1]
        params = refs[1:-1]
        assert len(params) == 2 * num_layers

        h = x_ref[...].astype(jnp.bfloat16)  # cast in-kernel: no wrapper HBM pass
        for l in range(num_layers):
            w_ref = params[2 * l]
            v_ref = params[2 * l + 1]
            acc = jnp.dot(h, w_ref[...], preferred_element_type=jnp.float32)
            if l + 1 < num_layers:
                # bias + ReLU; this layer's eval-BN is folded into the next layer's W/b.
                h = jnp.maximum(acc + v_ref[...], 0.0).astype(jnp.bfloat16)
            else:
                act = jnp.maximum(acc + v_ref[0:1, :], 0.0)
                o_ref[...] = (act * v_ref[1:2, :] + v_ref[2:3, :]).astype(o_ref.dtype)

    return kernel


def init_params(key, input_dim, hidden_dims):
    """Deterministic parameter init mirroring the torch module's shapes (f32, torch layout)."""
    params = []
    prev = input_dim
    for hd in hidden_dims:
        key, kw, kb, kg, kbe, km, kv = jax.random.split(key, 7)
        bound = 1.0 / jnp.sqrt(prev)
        w = jax.random.uniform(kw, (prev, hd), jnp.float32, -bound, bound)   # Linear.weight^T
        b = jax.random.uniform(kb, (1, hd), jnp.float32, -bound, bound)      # Linear.bias
        gamma = 1.0 + 0.1 * jax.random.normal(kg, (1, hd), jnp.float32)      # BN.weight
        beta = 0.1 * jax.random.normal(kbe, (1, hd), jnp.float32)            # BN.bias
        r_mean = 0.1 * jax.random.normal(km, (1, hd), jnp.float32)           # BN.running_mean
        r_var = jnp.abs(1.0 + 0.1 * jax.random.normal(kv, (1, hd), jnp.float32))  # BN.running_var
        params.extend([w, b, gamma, beta, r_mean, r_var])
        prev = hd
    return params


def fold_params(params, hidden_dims):
    """Fold eval-BN into (scale, shift); fold inner-layer affines into the next Linear."""
    num_layers = len(hidden_dims)
    ws, bs, scales, shifts = [], [], [], []
    for l in range(num_layers):
        w, b, gamma, beta, mean, var = params[6 * l:6 * (l + 1)]
        scale = gamma * jax.lax.rsqrt(var + BN_EPS)
        shift = beta - mean * scale
        ws.append(w)
        bs.append(b)
        scales.append(scale)
        shifts.append(shift)

    folded = []
    for l in range(num_layers):
        w = ws[l]
        b = bs[l]
        if l > 0:
            # y_{l-1} = scale*relu + shift  =>  z_l = relu @ (diag(scale) W_l) + (b_l + shift @ W_l)
            w = w * jnp.reshape(scales[l - 1], (-1, 1))
            b = b + shifts[l - 1] @ ws[l]
        if l + 1 < num_layers:
            vec = b                                                   # (1, hd)
        else:
            vec = jnp.concatenate([b, scales[l], shifts[l]], axis=0)  # (3, hd)
        folded.append(w.astype(jnp.bfloat16))
        folded.append(vec.astype(jnp.float32))
    return folded


def _vmem_bytes_needed(tile_b, input_dim, hidden_dims, out_bytes):
    x_tile = 2 * tile_b * input_dim * 4                 # double-buffered f32 input tile
    out_tile = 2 * tile_b * hidden_dims[-1] * out_bytes  # double-buffered output tile
    inter = 2 * tile_b * max(hidden_dims) * 4           # f32 acc / epilogue temps (estimate)
    prev = input_dim
    param = 0
    for l, hd in enumerate(hidden_dims):
        param += prev * hd * 2                                       # bf16 weights (single-buffered)
        param += (1 if l + 1 < len(hidden_dims) else 3) * hd * 4     # f32 vectors
        prev = hd
    return x_tile + out_tile + inter + param


def tabular_encoder(x, params, hidden_dims, out_dtype=jnp.bfloat16):
    num_layers = len(hidden_dims)
    batch, input_dim = x.shape
    out_dim = hidden_dims[-1]
    out_bytes = jnp.dtype(out_dtype).itemsize

    folded = fold_params(params, hidden_dims)

    vmem_cap = _vmem_capacity_bytes()
    max_tile_b = 2048 if vmem_cap >= (96 << 20) else 1024  # 128 MiB v5e/v6e vs 64 MiB v7x

    # Tile selection: multiple of 16 rows (8 for tiny batches), aim for >= 2 grid
    # steps so the "parallel" axis shards across both TensorCores on v7x.
    granule = 16 if batch >= 16 else 8
    tile_b = max(granule, min(max_tile_b, _round_up(pl.cdiv(batch, 2), granule)))
    tile_b = min(tile_b, _round_up(batch, granule))

    # Shrink tile_b (not just the limit) if the budget exceeds the VMEM cap.
    vmem_cap_usable = int(vmem_cap * 0.7)
    while tile_b > granule and _vmem_bytes_needed(tile_b, input_dim, hidden_dims, out_bytes) > vmem_cap_usable:
        tile_b = max(granule, ((tile_b // 2) // granule) * granule)

    needed = _vmem_bytes_needed(tile_b, input_dim, hidden_dims, out_bytes)
    vmem_limit = int(min(int(vmem_cap * 0.8), max(16 * 1024 * 1024, needed + 4 * 1024 * 1024)))

    grid = (pl.cdiv(batch, tile_b),)  # partial last block handled by Pallas masking

    in_specs = [pl.BlockSpec((tile_b, input_dim), lambda i: (i, 0))]
    prev = input_dim
    for l, hd in enumerate(hidden_dims):
        in_specs.append(_const_spec((prev, hd)))                      # weights, VMEM-resident
        in_specs.append(_const_spec((1 if l + 1 < num_layers else 3, hd)))
        prev = hd
    out_spec = pl.BlockSpec((tile_b, out_dim), lambda i: (i, 0))

    return pl.pallas_call(
        _make_encoder_kernel(num_layers),
        out_shape=jax.ShapeDtypeStruct((batch, out_dim), out_dtype),
        grid=grid,
        in_specs=in_specs,
        out_specs=out_spec,
        compiler_params=pltpu.CompilerParams(
            dimension_semantics=("parallel",),
            vmem_limit_bytes=vmem_limit),
    )(x, *folded)


def tabular_encoder_ref_folded(x, params, hidden_dims, out_dtype=jnp.bfloat16):
    """Pure-JAX reference mirroring the kernel's folded bf16-streaming numerics."""
    folded = fold_params(params, hidden_dims)
    num_layers = len(hidden_dims)
    h = x.astype(jnp.bfloat16)
    out = None
    for l in range(num_layers):
        w = folded[2 * l]
        v = folded[2 * l + 1]
        acc = jnp.dot(h, w, preferred_element_type=jnp.float32)
        if l + 1 < num_layers:
            h = jnp.maximum(acc + v, 0.0).astype(jnp.bfloat16)
        else:
            out = jnp.maximum(acc + v[0:1], 0.0) * v[1:2] + v[2:3]
    return out.astype(out_dtype)


def tabular_encoder_ref_f32(x, params, hidden_dims):
    """Faithful f32 eval-mode math of the torch module (Linear -> ReLU -> BN -> Dropout)."""
    h = x
    for l in range(len(hidden_dims)):
        w, b, gamma, beta, mean, var = params[6 * l:6 * (l + 1)]
        a = jnp.maximum(h @ w + b, 0.0)
        h = gamma * (a - mean) * jax.lax.rsqrt(var + BN_EPS) + beta
    return h


if __name__ == "__main__":
    batch = 8
    input_dim = 32
    hidden_dims = [256, 128]

    key = jax.random.PRNGKey(0)
    key, kx = jax.random.split(key)
    x = jax.random.normal(kx, (batch, input_dim), jnp.float32)
    params = init_params(key, input_dim, hidden_dims)

    run = jax.jit(functools.partial(tabular_encoder, hidden_dims=hidden_dims))
    out = jax.block_until_ready(run(x, params))

    assert out.shape == (batch, hidden_dims[-1])
    ref_mirror = tabular_encoder_ref_folded(x, params, hidden_dims)
    ref_f32 = tabular_encoder_ref_f32(x, params, hidden_dims)
    assert jnp.allclose(out.astype(jnp.float32), ref_mirror.astype(jnp.float32),
                        atol=1e-2, rtol=1e-2), "mismatch vs bf16-mirror reference"
    assert jnp.allclose(out.astype(jnp.float32), ref_f32,
                        atol=3e-2, rtol=3e-2), "mismatch vs f32 reference"

    print("KERNEL_OK")
</pallas_src>

<mosaic_0001>
module attributes {stable_mosaic.version = 11 : i64} {
  func.func @kernel(%arg0: i32, %arg1: memref<8x32xf32, #tpu.memory_space<vmem>>, %arg2: memref<32x256xbf16, #tpu.memory_space<vmem>>, %arg3: memref<1x256xf32, #tpu.memory_space<vmem>>, %arg4: memref<256x128xbf16, #tpu.memory_space<vmem>>, %arg5: memref<3x128xf32, #tpu.memory_space<vmem>>, %arg6: memref<8x128xbf16, #tpu.memory_space<vmem>>) attributes {dimension_semantics = [#tpu.dimension_semantics<parallel>], iteration_bounds = array<i64: 1>, scalar_prefetch = 0 : i64, scratch_operands = 0 : i64, tpu.core_type = #tpu.core_type<tc>, window_params = [{transform_indices = @transform_0, window_bounds = array<i64: 8, 32>}, {pipeline_mode = #tpu.pipeline_mode<synchronous>, transform_indices = @transform_1, window_bounds = array<i64: 32, 256>}, {pipeline_mode = #tpu.pipeline_mode<synchronous>, transform_indices = @transform_2, window_bounds = array<i64: 1, 256>}, {pipeline_mode = #tpu.pipeline_mode<synchronous>, transform_indices = @transform_3, window_bounds = array<i64: 256, 128>}, {pipeline_mode = #tpu.pipeline_mode<synchronous>, transform_indices = @transform_4, window_bounds = array<i64: 3, 128>}, {transform_indices = @transform_5, window_bounds = array<i64: 8, 128>}]} {
    %c0 = arith.constant 0 : index
    %c0_0 = arith.constant 0 : index
    %0 = vector.load %arg1[%c0, %c0_0] : memref<8x32xf32, #tpu.memory_space<vmem>>, vector<8x32xf32>
    %1 = arith.truncf %0 : vector<8x32xf32> to vector<8x32xbf16>
    %c0_1 = arith.constant 0 : index
    %c0_2 = arith.constant 0 : index
    %2 = vector.load %arg2[%c0_1, %c0_2] : memref<32x256xbf16, #tpu.memory_space<vmem>>, vector<32x256xbf16>
    %cst = arith.constant dense<0.000000e+00> : vector<8x256xf32>
    %3 = tpu.matmul %1, %2, %cst {dimension_numbers = #tpu.dot_dimension_numbers<[1], [0], [0], [1], [0, 0, 1, 1], [], []>} : vector<8x32xbf16>, vector<32x256xbf16>, vector<8x256xf32> -> vector<8x256xf32>
    %c0_3 = arith.constant 0 : index
    %c0_4 = arith.constant 0 : index
    %4 = vector.load %arg3[%c0_3, %c0_4] : memref<1x256xf32, #tpu.memory_space<vmem>>, vector<1x256xf32>
    %5 = vector.broadcast %4 : vector<1x256xf32> to vector<8x256xf32>
    %6 = arith.addf %3, %5 : vector<8x256xf32>
    %cst_5 = arith.constant 0.000000e+00 : f32
    %7 = vector.broadcast %cst_5 : f32 to vector<8x256xf32>
    %8 = arith.maximumf %6, %7 : vector<8x256xf32>
    %9 = arith.truncf %8 : vector<8x256xf32> to vector<8x256xbf16>
    %c0_6 = arith.constant 0 : index
    %c0_7 = arith.constant 0 : index
    %10 = vector.load %arg4[%c0_6, %c0_7] : memref<256x128xbf16, #tpu.memory_space<vmem>>, vector<256x128xbf16>
    %cst_8 = arith.constant dense<0.000000e+00> : vector<8x128xf32>
    %11 = tpu.matmul %9, %10, %cst_8 {dimension_numbers = #tpu.dot_dimension_numbers<[1], [0], [0], [1], [0, 0, 1, 1], [], []>} : vector<8x256xbf16>, vector<256x128xbf16>, vector<8x128xf32> -> vector<8x128xf32>
    %c0_9 = arith.constant 0 : index
    %c0_10 = arith.constant 0 : index
    %12 = vector.load %arg5[%c0_9, %c0_10] : memref<3x128xf32, #tpu.memory_space<vmem>>, vector<1x128xf32>
    %13 = vector.broadcast %12 : vector<1x128xf32> to vector<8x128xf32>
    %14 = arith.addf %11, %13 : vector<8x128xf32>
    %cst_11 = arith.constant 0.000000e+00 : f32
    %15 = vector.broadcast %cst_11 : f32 to vector<8x128xf32>
    %16 = arith.maximumf %14, %15 : vector<8x128xf32>
    %c1 = arith.constant 1 : index
    %c0_12 = arith.constant 0 : index
    %17 = vector.load %arg5[%c1, %c0_12] : memref<3x128xf32, #tpu.memory_space<vmem>>, vector<1x128xf32>
    %18 = vector.broadcast %17 : vector<1x128xf32> to vector<8x128xf32>
    %19 = arith.mulf %16, %18 : vector<8x128xf32>
    %c2 = arith.constant 2 : index
    %c0_13 = arith.constant 0 : index
    %20 = vector.load %arg5[%c2, %c0_13] : memref<3x128xf32, #tpu.memory_space<vmem>>, vector<1x128xf32>
    %21 = vector.broadcast %20 : vector<1x128xf32> to vector<8x128xf32>
    %22 = arith.addf %19, %21 : vector<8x128xf32>
    %23 = arith.truncf %22 : vector<8x128xf32> to vector<8x128xbf16>
    %c0_14 = arith.constant 0 : index
    %c0_15 = arith.constant 0 : index
    %24 = vector.load %arg6[%c0_14, %c0_15] : memref<8x128xbf16, #tpu.memory_space<vmem>>, vector<8x128xbf16>
    tpu.vector_store %arg6[%c0_14, %c0_15], %23 {strides = array<i32>} : memref<8x128xbf16, #tpu.memory_space<vmem>>, vector<8x128xbf16>,
    return
  }
  func.func @transform_0(%arg0: i32) -> (i32, i32) {
    %c0_i32 = arith.constant 0 : i32
    %c0_i32_0 = arith.constant 0 : i32
    return %arg0, %c0_i32 : i32, i32
  }
  func.func @transform_1(%arg0: i32) -> (i32, i32) {
    %c0_i32 = arith.constant 0 : i32
    %c0_i32_0 = arith.constant 0 : i32
    %c0_i32_1 = arith.constant 0 : i32
    return %c0_i32, %c0_i32_0 : i32, i32
  }
  func.func @transform_2(%arg0: i32) -> (i32, i32) {
    %c0_i32 = arith.constant 0 : i32
    %c0_i32_0 = arith.constant 0 : i32
    %c0_i32_1 = arith.constant 0 : i32
    return %c0_i32, %c0_i32_0 : i32, i32
  }
  func.func @transform_3(%arg0: i32) -> (i32, i32) {
    %c0_i32 = arith.constant 0 : i32
    %c0_i32_0 = arith.constant 0 : i32
    %c0_i32_1 = arith.constant 0 : i32
    return %c0_i32, %c0_i32_0 : i32, i32
  }
  func.func @transform_4(%arg0: i32) -> (i32, i32) {
    %c0_i32 = arith.constant 0 : i32
    %c0_i32_0 = arith.constant 0 : i32
    %c0_i32_1 = arith.constant 0 : i32
    return %c0_i32, %c0_i32_0 : i32, i32
  }
  func.func @transform_5(%arg0: i32) -> (i32, i32) {
    %c0_i32 = arith.constant 0 : i32
    %c0_i32_0 = arith.constant 0 : i32
    return %arg0, %c0_i32 : i32, i32
  }
}

</mosaic_0001>

<bundles_post_ra>
// kernel: tabular_encoder.1
= control target key start
LH: loop header
LB: loop body
LE: loop exit
PB: predicated region body
PF: predicated region fallthrough
CT: control target
= control target key end

     0   :  { %v405_v2 = vmov 0   ;;  %vm60_vm0 = vcmask 261120   ;;  %s524_s0 = inlined_call_operand.vmem [shape: f32[8,32], index: 0, kind: input, shape index: {}]   ;;  %s525_s1 = inlined_call_operand.vmem [shape: bf16[32,256], index: 1, kind: input, shape index: {}]   ;;  %s526_s2 = inlined_call_operand.vmem [shape: f32[1,256], index: 2, kind: input, shape index: {}]   ;;  %s527_s3 = inlined_call_operand.vmem [shape: bf16[256,128], index: 3, kind: input, shape index: {}]   ;;  %s528_s4 = inlined_call_operand.vmem [shape: f32[3,128], index: 4, kind: input, shape index: {}]   ;;  %s529_s5 = inlined_call_operand.hbm [shape: bf16[8,128], index: 5, kind: output, shape index: {}]  }
   0x1   :  { %v359_v0 = vld [vmem:[%s525_s1 + $0x4] ss:$8 sps:$4 sm:$0xff]   ;;  %v361_v1 = vld [vmem:[%s525_s1] ss:$8 sps:$4 sm:$0xff]   ;;  %96 = vmatprep.mubr.bf16.mxu0 %v405_v2  ;;  %v362_v3 = vld [vmem:[%s525_s1 + $0x14] ss:$8 sps:$4 sm:$0xff]  }
   0x2   :  { %64 = vmatprep.subr.bf16.mxu0 %v359_v0  ;;  %v364_v4 = vld [vmem:[%s525_s1 + $0x10] ss:$8 sps:$4 sm:$0xff]   ;;  %v22_v5 = vld [vmem:[%s524_s0] sm:$0xff]  ;;  %v367_v8 = vld [vmem:[%s527_s3 + $0x48] sm:$0xff]  }
   0x3   :  { %65 = vmatpush1.bf16.msra.mxu0 %v361_v1  ;;  %v365_v6 = vld [vmem:[%s527_s3 + $0x40] sm:$0xff]   ;;  %v23_v9 = vpack.c.bf16 %v22_v5, %v22_v5  ;;  %v368_v10 = vld [vmem:[%s527_s3 + $0x8] sm:$0xff]   ;;  %v369_v11 = vld [vmem:[%s527_s3 + $0x50] sm:$0xff]  }
   0x4   :  { %66 = vmatprep.subr.bf16.mxu0 %v362_v3  ;;  %v366_v7 = vld [vmem:[%s527_s3] sm:$0xff]   ;;  %335 = vmatprep.subr.bf16.mxu1 %v365_v6  ;;  %v370_v12 = vld [vmem:[%s527_s3 + $0x10] sm:$0xff]   ;;  %v371_v13 = vld [vmem:[%s527_s3 + $0x58] sm:$0xff]  }
   0x5   :  { %336 = vmatpush3.bf16.msra.mxu1 %v366_v7  ;;  %v372_v14 = vld [vmem:[%s527_s3 + $0x18] sm:$0xff]   ;;  %v373_v15 = vld [vmem:[%s527_s3 + $0x60] sm:$0xff]  }
   0x6   :  { %337 = vmatprep.subr.bf16.mxu1 %v367_v8  ;;  %v374_v16 = vld [vmem:[%s527_s3 + $0x20] sm:$0xff]  }
   0x7   :  { %67 = vmatpush1.bf16.msra.mxu0 %v364_v4 }
   0x9   :  { %338 = vmatpush3.bf16.msra.mxu1 %v368_v10 }
   0xa   :  { %315 = vmatmul.mubr.msk.bf16.vlgmr.msra.gmra.mrb[0].mxu0 %vm60_vm0, %v23_v9  ;;  %339 = vmatprep.subr.bf16.mxu1 %v369_v11 }
   0xd   :  { %340 = vmatpush3.bf16.msra.mxu1 %v370_v12 }
   0xe   :  { %341 = vmatprep.subr.bf16.mxu1 %v371_v13 }
  0x11   :  { %342 = vmatpush3.bf16.msra.mxu1 %v372_v14 }
  0x12   :  { %10 = vsyncpa [#allocation3], 0  ;;  %343 = vmatprep.subr.bf16.mxu1 %v373_v15  ;;  %v375_v17 = vld [vmem:[%s527_s3 + $0x68] sm:$0xff]   ;;  %v377_v19 = vld [vmem:[%s527_s3 + $0x70] sm:$0xff]   ;;  %v30_v23 = vlaneseq  ;;  %s406_s12 = smov [#allocation2]  }
  0x13   :  { %v376_v18 = vld [vmem:[%s527_s3 + $0x28] sm:$0xff]   ;;  %v378_v20 = vld [vmem:[%s527_s3 + $0x30] sm:$0xff]   ;;  %v379_v21 = vld [vmem:[%s527_s3 + $0x78] sm:$0xff]   ;;  %s303_s13 = sshll.u32 %s406_s12, 4  ;;  %s304_s13 = int_to_ptr.vmem [resolvable:$true] %s303_s13 }
  0x14   :  { %v380_v22 = vld [vmem:[%s527_s3 + $0x38] sm:$0xff]   ;;  %v31_v24 = vshrl.u32 %v30_v23, 7  ;;  %v28_v26 = vld [vmem:[%s526_s2] sm:$0x3]  ;;  %v334_v49 = vld [vmem:[%s528_s4 + $0x2] ss:$0 sm:$0xff]  ;;  %p386_p1 = scmp.lt.s32.totalorder %s304_s13, %s304_s13 }
  0x15   :  { %344 = vmatpush3.bf16.msra.mxu1 %v374_v16  ;;  %v316_v41 = vld [vmem:[%s528_s4] ss:$0 sm:$0xff]  ;;  %v333_v47 = vld [vmem:[%s528_s4 + $0x1] ss:$0 sm:$0xff]  ;;  %s381_s14 = scalar_lea.vmem %s304_s13, 64 }
  0x16   :  { %345 = vmatprep.subr.bf16.mxu1 %v375_v17  ;;  %v32_v25 = vsub.s32 0, %v31_v24  ;;  %v36_v27 = vsub.s32 1, %v31_v24  ;;  %p382_p0 = scmp.ne.s32.totalorder %s304_s13, %s381_s14  ;;  %p387_p2 = scmp.lt.s32.totalorder %s381_s14, %s381_s14 }
  0x18   :  { %v33_v28 = vrot.slane %v28_v26, %v32_v25  ;;  %v37_v29 = vrot.slane %v28_v26, %v36_v27  ;;  %p388_p3 = por %p387_p2, %p386_p1 }
  0x19   :  { %346 = vmatpush3.bf16.msra.mxu1 %v376_v18 }
  0x1a   :  { %347 = vmatprep.subr.bf16.mxu1 %v377_v19  ;;  %p389_p4 = pnand %p388_p3, %p382_p0 }
  0x1d   :  { %348 = vmatpush3.bf16.msra.mxu1 %v378_v20 }
  0x1e   :  { %349 = vmatprep.subr.bf16.mxu1 %v379_v21 }
  0x21   :  { %350 = vmatpush3.bf16.msra.mxu1 %v380_v22 }
  0xdd   :  { %v98_v30 = vpop.f32.mrb[0].mxu0 }
  0xde   :  { %v99_v31 = vadd.f32 %v98_v30, %v33_v28  ;;  %v100_v32 = vpop.f32.mrb[1].mxu0 }
  0xdf   :  { %v101_v33 = vadd.f32 %v100_v32, %v37_v29  ;;  %v102_v34 = vpop.f32.mrb[2].mxu0 }
  0xe0   :  { %v105_v35 = vmax.f32 %v99_v31, 0.0  ;;  %v103_v36 = vpop.f32.mrb[3].mxu0 }
  0xe1   :  { %v106_v37 = vmax.f32 %v101_v33, 0.0 }
  0xe2   :  { %v107_v39 = vpack.c.bf16 %v105_v35, %v105_v35 }
  0xe3   :  { %v108_v38 = vpack.c.bf16 %v106_v37, %v106_v37 }
  0xe5   :  { %274 = vmatprep.mubr.bf16.mxu1 %v108_v38 }
  0xe6   :  { %275 = vmatmul.mubr.bf16.vlgmr.msra.gmra.mrb[0].mxu1 %v107_v39 }
 0x1b9   :  { %v351_v40 = vpop.f32.mrb[0].mxu1 }
 0x1ba   :  { %v352_v42 = vpop.f32.mrb[1].mxu1 }
 0x1bb   :  { %v353_v43 = vadd.f32 %v352_v42, %v351_v40  ;;  %v354_v44 = vpop.f32.mrb[2].mxu1 }
 0x1bc   :  { %v355_v45 = vpop.f32.mrb[3].mxu1 }
 0x1bd   :  { %v277_v46 = vadd.f32 %v353_v43, %v316_v41 }
 0x1bf   :  { %v282_v48 = vmax.f32 %v277_v46, 0.0 }
 0x1c1   :  { %v288_v50 = vmul.f32 %v333_v47, %v282_v48 }
 0x1c3   :  { %v294_v51 = vadd.f32 %v334_v49, %v288_v50 }
 0x1c5   :  { %v295_v52 = vpack.c.bf16 %v294_v51, %v294_v51 }
 0x1c7   :  { %296 = vst [vmem:[#allocation2] sm:$0xf] %v295_v52 }
 0x1c8   :  { %392 = shalt.err (!%p389_p4)
}
 0x1c9   :  { %s393_s17 = scalar_lea.hbm %s529_s5, 64 }
 0x1ca   :  { %p394_p5 = scmp.ne.s32.totalorder %s529_s5, %s393_s17  ;;  %p397_p6 = scmp.lt.u32.totalorder %s393_s17, %s529_s5 }
 0x1cc   :  { %p399_p7 = pnand %p397_p6, %p394_p5 }
 0x1ce   :  { %402 = shalt.err (!%p399_p7)
}
 0x1cf   :  { %306 = dma.vmem_to_hbm [thread:$0]  %s304_s13, 64, %s529_s5, [#allocation3]  }
 0x1d0   :  { %403 = dma.done.wait [#allocation3], 64  }
 0x1d1   :  { %404 = vsyncadd [#allocation3], 4294967232 }
 0x1d2   :  { %310 = vsyncpa [#allocation3], 1 }

</bundles_post_ra>
